<compile_context>
chip_gen: v7x
topology: tpu7x:2x2x1
jax: 0.10.0
libtpu: 0.0.40
codegen_flags: <defaults>
</compile_context>

<pallas_src>
import jax
import jax.numpy as jnp
from jax.experimental import pallas as pl
from jax.experimental.pallas import tpu as pltpu


# --- the concrete lambda this script reproduces (elementwise) -------------
LAMBD = lambda x: x * 2.0 + 1.0

LANES = 128
MAX_W = 8192  # widest lane-dense last dim we use on the aligned path


def _lambda_kernel(x_ref, o_ref):
    # Elementwise application of the lambda on the current VMEM tile.
    o_ref[...] = LAMBD(x_ref[...]).astype(o_ref.dtype)


def _vmem_budget():
    """(target block bytes, scoped vmem limit) -- bigger on 128-MiB-VMEM chips."""
    try:
        cap = int(getattr(pltpu.get_tpu_info(), "vmem_capacity_bytes", 0))
    except Exception:
        cap = 0
    if cap >= 128 * 1024 * 1024:          # v5e / v6e
        return 8 * 1024 * 1024, 64 * 1024 * 1024
    return 4 * 1024 * 1024, 32 * 1024 * 1024  # v7x-safe default (64 MiB VMEM)


def _widest_aligned_width(n_aligned):
    """Largest multiple of 128 (<= MAX_W) dividing n_aligned (n_aligned % 128 == 0)."""
    for k in range(MAX_W // LANES, 0, -1):
        if n_aligned % (LANES * k) == 0:
            return LANES * k
    return LANES


def _pick_block_rows(rows, sub, row_bytes, target_block_bytes):
    """Rows per block: multiple of `sub` (or == rows), ~target bytes per block,
    and >= 2 grid steps whenever rows allows it (v7x megacore + pipelining)."""
    if rows <= sub:
        return rows  # single full-extent block (legal: equals full array dim)
    br = (target_block_bytes // max(row_bytes, 1)) // sub * sub
    br = max(br, sub)
    if rows >= 2 * sub:
        # Cap at ~rows/2 (rounded up to `sub`) so the grid has >= 2 steps.
        half = ((rows + 1) // 2 + sub - 1) // sub * sub
        br = min(br, half)
    if br >= rows:
        br = rows
    return br


def _apply_2d(x2d, target_block_bytes, vmem_limit):
    """Run the elementwise kernel over a 2-D slab with row-blocked tiling."""
    rows, w = x2d.shape
    dtype = x2d.dtype
    itemsize = jnp.dtype(dtype).itemsize
    sub = max(8, 32 // max(itemsize, 1))  # dtype-aware sublane granularity
    row_bytes = w * itemsize
    br = _pick_block_rows(rows, sub, row_bytes, target_block_bytes)
    grid = (pl.cdiv(rows, br),)
    n = rows * w

    return pl.pallas_call(
        _lambda_kernel,
        out_shape=jax.ShapeDtypeStruct((rows, w), dtype),
        grid=grid,
        in_specs=[pl.BlockSpec((br, w), lambda i: (i, 0))],
        out_specs=pl.BlockSpec((br, w), lambda i: (i, 0)),
        compiler_params=pltpu.CompilerParams(
            dimension_semantics=("parallel",),
            vmem_limit_bytes=vmem_limit,
        ),
        cost_estimate=pl.CostEstimate(
            flops=2 * n,                      # one mul + one add per element
            transcendentals=0,
            bytes_accessed=2 * n * itemsize,  # pure HBM streaming: read + write
        ),
    )(x2d)


def lambda_forward(x, *, min_pallas_bytes=512 * 1024):
    """Apply LAMBD elementwise to x (any shape) via a Pallas TPU kernel."""
    orig_shape = x.shape
    dtype = x.dtype
    n = x.size
    itemsize = jnp.dtype(dtype).itemsize

    # Small-input fast path: XLA's fused elementwise op wins below this size;
    # the Pallas call would be pure dispatch + pipeline-priming overhead.
    if n == 0 or n * itemsize < min_pallas_bytes:
        return LAMBD(x).astype(dtype)

    target_block_bytes, vmem_limit = _vmem_budget()

    # --- 128-aligned flat size: lane-dense slab, zero wrapper copies --------
    if n % LANES == 0:
        w = _widest_aligned_width(n)
        out2d = _apply_2d(jnp.reshape(x, (n // w, w)),
                          target_block_bytes, vmem_limit)
        return jnp.reshape(out2d, orig_shape)

    # --- ragged flat size: copy-free (R, C) factorization from trailing dims.
    # The non-128 last dim is handled by Mosaic's masked lane stores (a few %
    # lane waste), which beats the 2 extra HBM passes of a pad+slice path.
    c = 1
    for d in reversed(orig_shape):
        if c >= 512:
            break
        c *= int(d)
    r = n // c
    sub = max(8, 32 // max(itemsize, 1))
    if c <= 65536 and min(r, sub) * c * itemsize <= target_block_bytes:
        out2d = _apply_2d(jnp.reshape(x, (r, c)), target_block_bytes, vmem_limit)
        return jnp.reshape(out2d, orig_shape)

    # --- pathological ragged layout (huge indivisible trailing dim): pad once.
    # TODO(synk): a memory_space=pl.ANY + manual masked-DMA path would remove
    # these two extra HBM passes; not worth the complexity for this fallback.
    n_pad = pl.cdiv(n, LANES) * LANES
    x_flat = jnp.pad(jnp.reshape(x, (-1,)), (0, n_pad - n))
    w = _widest_aligned_width(n_pad)
    out2d = _apply_2d(jnp.reshape(x_flat, (n_pad // w, w)),
                      target_block_bytes, vmem_limit)
    return jnp.reshape(jnp.reshape(out2d, (-1,))[:n], orig_shape)


if __name__ == "__main__":
    key = jax.random.PRNGKey(0)
    k1, k2, k3, k4 = jax.random.split(key, 4)

    def check(x, **kw):
        out = jax.block_until_ready(lambda_forward(x, **kw))
        ref = LAMBD(x)
        assert out.shape == ref.shape and out.dtype == ref.dtype
        assert jnp.allclose(out, ref, atol=1e-6, rtol=1e-6)

    # Small NCHW input (batch=2, channels=4, spatial=16x16) -> fast path.
    x_small = jax.random.normal(k1, (2, 4, 16, 16), dtype=jnp.float32)
    check(x_small)
    # Same small input forced through the Pallas kernel (single-block grid).
    check(x_small, min_pallas_bytes=0)
    # 128-aligned mid-size input -> lane-dense path with >= 2 grid steps.
    check(jax.random.normal(k2, (8, 4, 128, 128), dtype=jnp.float32))
    # Ragged flat size -> copy-free (R, C) path with masked lane stores.
    check(jax.random.normal(k3, (2, 4, 181, 181), dtype=jnp.float32))
    # Pathological ragged trailing dim -> pad fallback path.
    check(jax.random.normal(k4, (3, 100003), dtype=jnp.float32))

    print("KERNEL_OK")
</pallas_src>

<mosaic_0001>
module attributes {stable_mosaic.version = 11 : i64} {
  func.func @_lambda_kernel(%arg0: i32, %arg1: memref<1x2048xf32, #tpu.memory_space<vmem>>, %arg2: memref<1x2048xf32, #tpu.memory_space<vmem>>) attributes {dimension_semantics = [#tpu.dimension_semantics<parallel>], iteration_bounds = array<i64: 1>, scalar_prefetch = 0 : i64, scratch_operands = 0 : i64, tpu.core_type = #tpu.core_type<tc>, window_params = [{transform_indices = @transform_0, window_bounds = array<i64: 1, 2048>}, {transform_indices = @transform_1, window_bounds = array<i64: 1, 2048>}]} {
    %c0 = arith.constant 0 : index
    %c0_0 = arith.constant 0 : index
    %0 = vector.load %arg1[%c0, %c0_0] : memref<1x2048xf32, #tpu.memory_space<vmem>>, vector<1x2048xf32>
    %cst = arith.constant 2.000000e+00 : f32
    %1 = vector.broadcast %cst : f32 to vector<1x2048xf32>
    %2 = arith.mulf %0, %1 : vector<1x2048xf32>
    %cst_1 = arith.constant 1.000000e+00 : f32
    %3 = vector.broadcast %cst_1 : f32 to vector<1x2048xf32>
    %4 = arith.addf %2, %3 : vector<1x2048xf32>
    %c0_2 = arith.constant 0 : index
    %c0_3 = arith.constant 0 : index
    %5 = vector.load %arg2[%c0_2, %c0_3] : memref<1x2048xf32, #tpu.memory_space<vmem>>, vector<1x2048xf32>
    tpu.vector_store %arg2[%c0_2, %c0_3], %4 {strides = array<i32>} : memref<1x2048xf32, #tpu.memory_space<vmem>>, vector<1x2048xf32>,
    return
  }
  func.func @transform_0(%arg0: i32) -> (i32, i32) {
    %c0_i32 = arith.constant 0 : i32
    %c0_i32_0 = arith.constant 0 : i32
    return %arg0, %c0_i32 : i32, i32
  }
  func.func @transform_1(%arg0: i32) -> (i32, i32) {
    %c0_i32 = arith.constant 0 : i32
    %c0_i32_0 = arith.constant 0 : i32
    return %arg0, %c0_i32 : i32, i32
  }
}

</mosaic_0001>

<bundles_post_ra>
// kernel: tpu_custom_call.1
= control target key start
LH: loop header
LB: loop body
LE: loop exit
PB: predicated region body
PF: predicated region fallthrough
CT: control target
= control target key end

     0   :  { %6 = vsyncpa [#allocation3], 0  ;;  %s130_s0 = inlined_call_operand.hbm [shape: f32[1,2048], index: 0, kind: input, shape index: {}]   ;;  %s131_s1 = inlined_call_operand.hbm [shape: f32[1,2048], index: 1, kind: output, shape index: {}]  }
   0x1   :  { %7 = vsyncpa [#allocation4], 0  ;;  %s94_s6 = smov [#allocation2]   ;;  %s46_s10 = scalar_lea.hbm %s130_s0, 256 }
   0x2   :  { %s14_s7 = sshll.u32 %s94_s6, 4  ;;  %p47_p0 = scmp.ne.s32.totalorder %s130_s0, %s46_s10  ;;  %s15_s7 = int_to_ptr.vmem [resolvable:$true] %s14_s7 }
   0x3   :  { %p50_p1 = scmp.lt.u32.totalorder %s46_s10, %s130_s0 }
   0x5   :  { %p52_p2 = pnand %p50_p1, %p47_p0 }
   0x7   :  { %55 = shalt.err (!%p52_p2)
}
   0x8   :  { %s56_s15 = scalar_lea.vmem %s15_s7, 256  ;;  %p61_p4 = scmp.lt.s32.totalorder %s15_s7, %s15_s7 }
   0x9   :  { %p57_p3 = scmp.ne.s32.totalorder %s15_s7, %s56_s15  ;;  %p62_p5 = scmp.lt.s32.totalorder %s56_s15, %s56_s15 }
   0xb   :  { %p63_p6 = por %p62_p5, %p61_p4 }
   0xd   :  { %p64_p7 = pnand %p63_p6, %p57_p3 }
   0xf   :  { %67 = shalt.err (!%p64_p7)
}
  0x10   :  { %17 = dma.hbm_to_vmem [thread:$0]  %s130_s0, 256, %s15_s7, [#allocation3]  }
  0x11   :  { %90 = dma.done.wait [#allocation3], 256  }
  0x12   :  { %91 = vsyncadd [#allocation3], 4294967040  ;;  %v21_v0 = vld [vmem:[#allocation2] sm:$0xff]  ;;  %v22_v1 = vld [vmem:[#allocation2 + $0x8] sm:$0xff]  ;;  %s95_s18 = smov [#allocation5]  }
  0x13   :  { %s35_s19 = sshll.u32 %s95_s18, 4  ;;  %v23_v2 = vmul.f32 2.0, %v21_v0  ;;  %v24_v3 = vmul.f32 2.0, %v22_v1  ;;  %s36_s19 = int_to_ptr.vmem [resolvable:$true] %s35_s19 }
  0x14   :  { %s68_s20 = scalar_lea.vmem %s36_s19, 256  ;;  %p73_p9 = scmp.lt.s32.totalorder %s36_s19, %s36_s19 }
  0x15   :  { %v25_v4 = vadd.f32 1.0, %v23_v2  ;;  %v26_v5 = vadd.f32 1.0, %v24_v3  ;;  %p69_p8 = scmp.ne.s32.totalorder %s36_s19, %s68_s20  ;;  %p74_p10 = scmp.lt.s32.totalorder %s68_s20, %s68_s20 }
  0x17   :  { %27 = vst [vmem:[#allocation5] sm:$0xff] %v25_v4  ;;  %28 = vst [vmem:[#allocation5 + $0x8] sm:$0xff] %v26_v5  ;;  %p75_p11 = por %p74_p10, %p73_p9 }
  0x19   :  { %p76_p12 = pnand %p75_p11, %p69_p8 }
  0x1b   :  { %79 = shalt.err (!%p76_p12)
}
  0x1c   :  { %s80_s22 = scalar_lea.hbm %s131_s1, 256 }
  0x1d   :  { %p81_p13 = scmp.ne.s32.totalorder %s131_s1, %s80_s22  ;;  %p84_p0 = scmp.lt.u32.totalorder %s80_s22, %s131_s1 }
  0x1f   :  { %p86_p1 = pnand %p84_p0, %p81_p13 }
  0x21   :  { %89 = shalt.err (!%p86_p1)
}
  0x22   :  { %38 = dma.vmem_to_hbm [thread:$0]  %s36_s19, 256, %s131_s1, [#allocation4]  }
  0x23   :  { %92 = dma.done.wait [#allocation4], 256  }
  0x24   :  { %93 = vsyncadd [#allocation4], 4294967040 }
  0x25   :  { %42 = vsyncpa [#allocation3], 1 }
  0x26   :  { %43 = vsyncpa [#allocation4], 1 }

</bundles_post_ra>
